<compile_context>
chip_gen: v5e
topology: v5e:2x2
jax: 0.10.0
libtpu: 0.0.40
codegen_flags: <defaults>
</compile_context>

<pallas_src>
import functools

import jax
import jax.numpy as jnp
from jax.experimental import pallas as pl
from jax.experimental.pallas import tpu as pltpu


# ----------------------------- kernel body ----------------------------------


def _layernorm_kernel(x_ref, g_ref, b_ref, o_ref, *, epsilon: float, features: int):
    # x_ref: (block_rows, features); g_ref/b_ref: (1, features)
    x = x_ref[...].astype(jnp.float32)
    n = float(features)

    # Pass 1: mean.
    mean = jnp.sum(x, axis=-1, keepdims=True) * (1.0 / n)

    # Pass 2: centered sum of squares -> unbiased variance (Bessel), exactly
    # like torch.std() default. features == 1 yields NaN, matching torch.
    inv_nm1 = (1.0 / (features - 1)) if features > 1 else float("nan")
    xc = x - mean
    var = jnp.sum(xc * xc, axis=-1, keepdims=True) * inv_nm1
    std = jnp.sqrt(var)

    # Approx reciprocal uses the otherwise-idle EUP slot; one Newton-Raphson
    # step restores ~f32 accuracy so the 1e-5-level reference check holds.
    d = std + epsilon
    inv = pl.reciprocal(d, approx=True)
    inv = inv * (2.0 - d * inv)

    gain = g_ref[...].astype(jnp.float32)
    bias = b_ref[...].astype(jnp.float32)
    y = gain * (xc * inv) + bias
    o_ref[...] = y.astype(o_ref.dtype)


# ----------------------------- tiling policy ---------------------------------

_MIN_GRID_STEPS = 4   # enough steps for DMA/compute overlap + both v7x TCs
_MIN_HARD_STEPS = 2   # never collapse to a single step when rows allow
_SMALL_BLOCK_BYTES = 2 << 20  # below this, relax 4-step target to 2 steps


def _cdiv(a, b):
    return (a + b - 1) // b


def _round_up(x, m):
    return ((x + m - 1) // m) * m


def _sublane_multiple(dtype):
    # f32 -> 8, bf16/f16 -> 16, int8/fp8 -> 32 (packed-dtype minimum tiles).
    itemsize = jnp.dtype(dtype).itemsize
    return max(8, 32 // max(1, itemsize))


def _vmem_capacity_bytes():
    try:
        return int(pltpu.get_tpu_info().vmem_capacity_bytes)
    except Exception:
        return 64 << 20  # conservative fallback (v7x-sized VMEM per TC)


def _generation_policy():
    """Returns (block_budget_bytes, max_block_rows, vmem_limit_cap_bytes)."""
    cap = _vmem_capacity_bytes()
    if cap >= (100 << 20):
        # 128 MiB VMEM parts (v5e / v6e): bigger blocks amortize per-step cost.
        return 88 << 20, 2048, 96 << 20
    # v7x: 64 MiB VMEM per TensorCore — leave headroom for compiler scratch.
    return 36 << 20, 1024, 44 << 20


def _per_row_vmem_bytes(features, in_bytes, out_bytes):
    # Double-buffered input + output blocks, plus ~4 f32 temporaries the kernel
    # body materializes (upcast x, centered x, squared, y).
    return features * (2 * in_bytes + 2 * out_bytes + 4 * 4)


def _pick_block_rows(rows, features, dtype):
    sublane = _sublane_multiple(dtype)
    in_bytes = jnp.dtype(dtype).itemsize
    per_row = _per_row_vmem_bytes(features, in_bytes, in_bytes)

    budget, max_rows, _ = _generation_policy()
    budget_rows = max(sublane, budget // per_row)

    # Cap block_rows so the grid has >= 4 steps (pipeline overlap + 2 TCs on
    # v7x). If that shrinks the input block below ~2 MiB, fall back to the
    # 2-step target so the fixed ~0.35 us/step overhead stays small relative
    # to the per-step DMA (matters most on v7x's 3.2 TB/s HBM).
    steps_cap4 = max(sublane, _round_up(_cdiv(rows, _MIN_GRID_STEPS), sublane))
    steps_cap2 = max(sublane, _round_up(_cdiv(rows, _MIN_HARD_STEPS), sublane))

    block_rows = min(max_rows, budget_rows, steps_cap4)
    if block_rows * features * in_bytes < _SMALL_BLOCK_BYTES:
        block_rows = min(max_rows, budget_rows, steps_cap2)

    block_rows = min(block_rows, _round_up(rows, sublane))
    block_rows = max(sublane, (block_rows // sublane) * sublane)
    return block_rows


# ------------------------------ wrapper --------------------------------------


def layer_normalization(x, gain, bias, epsilon=1e-6, block_rows=None):
    """x: (..., features). gain/bias: (features,). Returns same shape/dtype as x."""
    orig_shape = x.shape
    features = orig_shape[-1]
    rows = 1
    for d in orig_shape[:-1]:
        rows *= d

    x2d = x.reshape(rows, features)
    g2d = gain.reshape(1, features)
    b2d = bias.reshape(1, features)

    sublane = _sublane_multiple(x2d.dtype)
    if block_rows is None:
        block_rows = _pick_block_rows(rows, features, x2d.dtype)
    else:
        block_rows = max(sublane, (int(block_rows) // sublane) * sublane)

    # Ragged last block handled by Pallas: no jnp.pad copy of x, no output slice.
    grid = (pl.cdiv(rows, block_rows),)

    # Explicit scoped-VMEM limit sized for the chosen tile; the cap is
    # generation-aware (96 MiB on 128 MiB parts, 44 MiB on v7x's 64 MiB/TC).
    in_bytes = x2d.dtype.itemsize
    _, _, limit_cap = _generation_policy()
    vmem_limit = block_rows * _per_row_vmem_bytes(features, in_bytes, in_bytes) + (4 << 20)
    vmem_limit = int(min(max(vmem_limit, 32 << 20), limit_cap))

    kernel = functools.partial(_layernorm_kernel, epsilon=float(epsilon), features=features)

    out = pl.pallas_call(
        kernel,
        out_shape=jax.ShapeDtypeStruct((rows, features), x.dtype),
        grid_spec=pltpu.PrefetchScalarGridSpec(
            num_scalar_prefetch=0,
            grid=grid,
            in_specs=[
                pl.BlockSpec((block_rows, features), lambda i: (i, 0)),
                pl.BlockSpec((1, features), lambda i: (0, 0)),  # gain: fetched once
                pl.BlockSpec((1, features), lambda i: (0, 0)),  # bias: fetched once
            ],
            out_specs=pl.BlockSpec((block_rows, features), lambda i: (i, 0)),
        ),
        compiler_params=pltpu.CompilerParams(
            # Row axis is fully independent -> shards across v7x's 2 TensorCores.
            dimension_semantics=("parallel",),
            vmem_limit_bytes=vmem_limit,
        ),
    )(x2d, g2d, b2d)

    return out.reshape(orig_shape)


# ------------------------------ reference ------------------------------------


def _reference(x, gain, bias, epsilon=1e-6):
    x32 = x.astype(jnp.float32)
    mean = jnp.mean(x32, axis=-1, keepdims=True)
    var = jnp.var(x32, axis=-1, keepdims=True, ddof=1)  # unbiased, like torch.std
    std = jnp.sqrt(var)
    return (gain * (x32 - mean) / (std + epsilon) + bias).astype(x.dtype)


if __name__ == "__main__":
    batch, seq, hidden = 2, 8, 32

    key = jax.random.PRNGKey(0)
    x = jax.random.normal(key, (batch, seq, hidden), dtype=jnp.float32)

    # Deterministic parameters matching nn.Parameter(torch.ones/zeros(features)).
    gain = jnp.ones((hidden,), dtype=jnp.float32)
    bias = jnp.zeros((hidden,), dtype=jnp.float32)

    out = layer_normalization(x, gain, bias, epsilon=1e-6)
    out = jax.block_until_ready(out)

    ref = _reference(x, gain, bias, epsilon=1e-6)
    assert out.shape == x.shape and out.dtype == x.dtype
    assert jnp.allclose(out, ref, atol=1e-5, rtol=1e-4), "mismatch vs reference"

    print("KERNEL_OK")
</pallas_src>

<mosaic_0001>
module attributes {stable_mosaic.version = 11 : i64} {
  func.func @_layernorm_kernel(%arg0: i32, %arg1: memref<8x32xf32, #tpu.memory_space<vmem>>, %arg2: memref<1x32xf32, #tpu.memory_space<vmem>>, %arg3: memref<1x32xf32, #tpu.memory_space<vmem>>, %arg4: memref<8x32xf32, #tpu.memory_space<vmem>>) attributes {dimension_semantics = [#tpu.dimension_semantics<parallel>], iteration_bounds = array<i64: 2>, scalar_prefetch = 0 : i64, scratch_operands = 0 : i64, tpu.core_type = #tpu.core_type<tc>, window_params = [{transform_indices = @transform_0, window_bounds = array<i64: 8, 32>}, {pipeline_mode = #tpu.pipeline_mode<synchronous>, transform_indices = @transform_1, window_bounds = array<i64: 1, 32>}, {pipeline_mode = #tpu.pipeline_mode<synchronous>, transform_indices = @transform_2, window_bounds = array<i64: 1, 32>}, {transform_indices = @transform_3, window_bounds = array<i64: 8, 32>}]} {
    %c0 = arith.constant 0 : index
    %c0_0 = arith.constant 0 : index
    %0 = vector.load %arg1[%c0, %c0_0] : memref<8x32xf32, #tpu.memory_space<vmem>>, vector<8x32xf32>
    %cst = arith.constant dense<0.000000e+00> : vector<8xf32>
    %1 = vector.multi_reduction <add>, %0, %cst [1] : vector<8x32xf32> to vector<8xf32>
    %2 = vector.shape_cast %1 : vector<8xf32> to vector<8x1xf32>
    %cst_1 = arith.constant 3.125000e-02 : f32
    %3 = vector.broadcast %cst_1 : f32 to vector<8x1xf32>
    %4 = arith.mulf %2, %3 : vector<8x1xf32>
    %5 = vector.broadcast %4 : vector<8x1xf32> to vector<8x32xf32>
    %6 = arith.subf %0, %5 : vector<8x32xf32>
    %7 = arith.mulf %6, %6 : vector<8x32xf32>
    %cst_2 = arith.constant dense<0.000000e+00> : vector<8xf32>
    %8 = vector.multi_reduction <add>, %7, %cst_2 [1] : vector<8x32xf32> to vector<8xf32>
    %9 = vector.shape_cast %8 : vector<8xf32> to vector<8x1xf32>
    %cst_3 = arith.constant 0.0322580636 : f32
    %10 = vector.broadcast %cst_3 : f32 to vector<8x1xf32>
    %11 = arith.mulf %9, %10 : vector<8x1xf32>
    %12 = math.sqrt %11 : vector<8x1xf32>
    %cst_4 = arith.constant 9.99999997E-7 : f32
    %13 = vector.broadcast %cst_4 : f32 to vector<8x1xf32>
    %14 = arith.addf %12, %13 : vector<8x1xf32>
    %15 = tpu.reciprocal %14 {approx = true} : vector<8x1xf32> -> vector<8x1xf32>
    %16 = arith.mulf %14, %15 : vector<8x1xf32>
    %cst_5 = arith.constant 2.000000e+00 : f32
    %17 = vector.broadcast %cst_5 : f32 to vector<8x1xf32>
    %18 = arith.subf %17, %16 : vector<8x1xf32>
    %19 = arith.mulf %15, %18 : vector<8x1xf32>
    %c0_6 = arith.constant 0 : index
    %c0_7 = arith.constant 0 : index
    %20 = vector.load %arg2[%c0_6, %c0_7] : memref<1x32xf32, #tpu.memory_space<vmem>>, vector<1x32xf32>
    %c0_8 = arith.constant 0 : index
    %c0_9 = arith.constant 0 : index
    %21 = vector.load %arg3[%c0_8, %c0_9] : memref<1x32xf32, #tpu.memory_space<vmem>>, vector<1x32xf32>
    %22 = vector.broadcast %19 : vector<8x1xf32> to vector<8x32xf32>
    %23 = arith.mulf %6, %22 : vector<8x32xf32>
    %24 = vector.broadcast %20 : vector<1x32xf32> to vector<8x32xf32>
    %25 = arith.mulf %24, %23 : vector<8x32xf32>
    %26 = vector.broadcast %21 : vector<1x32xf32> to vector<8x32xf32>
    %27 = arith.addf %25, %26 : vector<8x32xf32>
    %c0_10 = arith.constant 0 : index
    %c0_11 = arith.constant 0 : index
    %28 = vector.load %arg4[%c0_10, %c0_11] : memref<8x32xf32, #tpu.memory_space<vmem>>, vector<8x32xf32>
    tpu.vector_store %arg4[%c0_10, %c0_11], %27 {strides = array<i32>} : memref<8x32xf32, #tpu.memory_space<vmem>>, vector<8x32xf32>,
    return
  }
  func.func @transform_0(%arg0: i32) -> (i32, i32) {
    %c0_i32 = arith.constant 0 : i32
    %c0_i32_0 = arith.constant 0 : i32
    return %arg0, %c0_i32 : i32, i32
  }
  func.func @transform_1(%arg0: i32) -> (i32, i32) {
    %c0_i32 = arith.constant 0 : i32
    %c0_i32_0 = arith.constant 0 : i32
    %c0_i32_1 = arith.constant 0 : i32
    return %c0_i32, %c0_i32_0 : i32, i32
  }
  func.func @transform_2(%arg0: i32) -> (i32, i32) {
    %c0_i32 = arith.constant 0 : i32
    %c0_i32_0 = arith.constant 0 : i32
    %c0_i32_1 = arith.constant 0 : i32
    return %c0_i32, %c0_i32_0 : i32, i32
  }
  func.func @transform_3(%arg0: i32) -> (i32, i32) {
    %c0_i32 = arith.constant 0 : i32
    %c0_i32_0 = arith.constant 0 : i32
    return %arg0, %c0_i32 : i32, i32
  }
}

</mosaic_0001>

<bundles_post_ra>
// kernel: tpu_custom_call.1
= control target key start
LH: loop header
LB: loop body
LE: loop exit
PB: predicated region body
PF: predicated region fallthrough
CT: control target
= control target key end

     0   :  { %8 = vsyncpa [#allocation3], 0  ;;  %s718_s0 = inlined_call_operand.hbm [shape: f32[16,32], index: 0, kind: input, shape index: {}]   ;;  %s719_s1 = inlined_call_operand.hbm [shape: f32[1,32], index: 1, kind: input, shape index: {}]   ;;  %s720_s2 = inlined_call_operand.vmem [shape: f32[1,32], index: 2, kind: input, shape index: {}]   ;;  %s721_s3 = inlined_call_operand.hbm [shape: f32[16,32], index: 3, kind: output, shape index: {}]  }
   0x1   :  { %10 = vsyncpa [#allocation3 + $0x1], 0 }
   0x2   :  { %11 = vsyncpa [#allocation6], 0 }
   0x3   :  { %12 = vsyncpa [#allocation4], 0 }
   0x4   :  { %14 = vsyncpa [#allocation4 + $0x1], 0  ;;  %s570_s12 = smov 0   ;;  %s572_s13 = smov 0  }
   0x5   :  { %s574_s14 = smov 0   ;;  %s576_s15 = smov 0  }
   0x6 LB: > { %s591_s16 = sadd.s32 4294967295, %s547_s15   ;;  %s340_s17 = sadd.s32 4294967294, %s547_s15   ;;  %s547_s15 = sphi %s576_s15, %s731_s15   ;;  %s543_s14 = sphi %s574_s14, %s730_s14   ;;  %s539_s13 = sphi %s572_s13, %s729_s13   ;;  %s535_s12 = sphi %s570_s12, %s728_s12  }
   0x7   : > { %p40_p0 = scmp.ne.s32.totalorder %s539_s13, %s535_s12  ;;  %p41_p1 = scmp.eq.s32.totalorder %s591_s16, 0 }
   0x8   : > { %p106_p2 = scmp.eq.s32.totalorder %s591_s16, 1  ;;  %p112_p3 = scmp.eq.s32.totalorder %s340_s17, 1 }
   0x9   : > { %p600_p4 = por %p41_p1, %p40_p0  ;;  %p341_p5 = scmp.ge.s32.totalorder %s547_s15, 1 }
   0xa   : > { %p605_p6 = por %p112_p3, %p40_p0  ;;  %p119_p7 = scmp.lt.s32.totalorder %s547_s15, 3 }
   0xb   : > { %s131_s22 = sshll.u32 %s719_s1, 4  ;;  %s549_s24 = smov [#allocation5]   ;;  %s132_s22 = int_to_ptr.hbm [resolvable:$true] %s131_s22 }
   0xc   : > { %p613_p8 = pnand %p341_p5, %p119_p7  ;;  %s133_s25 = sshll.u32 %s549_s24, 4  ;;  %s134_s25 = int_to_ptr.vmem [resolvable:$true] %s133_s25 }
   0xd   : > { %s623_s26 = sadd.s32 1, %s547_s15   ;;  %s27_s27 = sadd.s32 1, %s543_s14 }
   0xe   : > { %p362_p10 = pneg %p613_p8  ;;  %s24_s28 = ssub.s32 %s547_s15, %s623_s26 }
   0xf   : > { %p25_p12 = scmp.eq.s32.totalorder %s24_s28, 0  ;;  %p34_p13 = scmp.ne.s32.totalorder %s543_s14, %s539_s13 }
  0x10   : > { %p363_p11 = pnand %p362_p10, %p41_p1  ;;  %p35_p0 = scmp.eq.s32.totalorder %s547_s15, 0 }
  0x11   : > { %s632_s29 = scalar_select %p25_p12, %s543_s14, %s27_s27  }
  0x12   : > { %365 = dma.hbm_to_vmem [thread:$0]  (!%p363_p11), %s132_s22, 16, %s134_s25, [#allocation6]  }
  0x13   : > { %p636_p3 = por %p106_p2, %p34_p13  ;;  %p375_p5 = scmp.lt.s32.totalorder %s547_s15, 2 }
  0x14   : > { %s147_s4 = sand.u32 1, %s543_s14   ;;  %s345_s5 = sshll.u32 %s547_s15, 3 }
  0x15   : > { %p36_p7 = por %p35_p0, %p34_p13  ;;  %s344_s6 = sshll.u32 %s147_s4, 3 }
  0x16   : > { %s155_s9 = scalar_lea.hbm %s718_s0, %s345_s5  ;;  %s151_s11 = scalar_lea.vmem [#allocation2], %s344_s6 }
  0x17   : > { %s157_s10 = sshll.u32 %s155_s9, 4  ;;  %s159_s17 = sshll.u32 %s151_s11, 4  ;;  %s158_s10 = int_to_ptr.hbm [resolvable:$true] %s157_s10  ;;  %s160_s17 = int_to_ptr.vmem [resolvable:$true] %s159_s17 }
  0x18   : > { %p646_p10 = pnand %p375_p5, %p36_p7  ;;  %s148_s21 = scalar_lea.sflag [#allocation3], %s147_s4 }
  0x19   : > { %s447_s22 = sshra.s32 %s158_s10, 4  ;;  %s454_s28 = scalar_lea.hbm %s718_s0, 16  ;;  %s448_s22 = int_to_ptr.hbm [resolvable:$true] %s447_s22 }
  0x1a   : > { %s449_s24 = scalar_lea.hbm %s448_s22, 8  ;;  %p451_p11 = pneg %p646_p10 }
  0x1b   : > { %p450_p2 = scmp.ne.s32.totalorder %s448_s22, %s449_s24  ;;  %p455_p0 = scmp.lt.s32.totalorder %s448_s22, %s718_s0 }
  0x1c   : > { %p456_p5 = scmp.lt.s32.totalorder %s454_s28, %s449_s24 }
  0x1d   : > { %p452_p12 = pnand %p451_p11, %p450_p2 }
  0x1e   : > { %p457_p7 = por %p456_p5, %p455_p0 }
  0x1f   : > { %p453_p13 = pneg %p452_p12 }
  0x21   : > { %p458_p9 = pnand %p457_p7, %p453_p13 }
  0x23   : > { %461 = shalt.err (!%p458_p9)
}
  0x24   : > { %369 = dma.hbm_to_vmem [thread:$0]  (!%p646_p10), %s158_s10, 128, %s160_s17, %s148_s21  }
  0x25   : > { %168 = sbr.rel (%p613_p8) target bundleno = 333 (0x14d), region = 32  ;;  %s663_s4 = sand.u32 (!%p613_p8), 1, %s539_s13  }
  0x26   : > { %s347_s7 = sshll.u32 (!%p613_p8), %s663_s4, 3  ;;  %s171_s8 = scalar_lea.sflag (!%p613_p8), [#allocation3], %s663_s4 }
  0x27   : > { %s174_s9 = scalar_lea.vmem (!%p613_p8), [#allocation2], %s347_s7 }
  0x2a   : > { %522 = dma.done.wait (%p600_p4), %s171_s8, 128  }
  0x2b   : > { %524 = vsyncadd (%p600_p4), %s171_s8, 4294967168 }
  0x2c   : > { %526 = dma.done.wait (%p41_p1), [#allocation6], 16  }
  0x2d   : > { %528 = vsyncadd (%p41_p1), [#allocation6], 4294967280  ;;  %vm204_vm0 = vcmask 261120   ;;  %v203_v0 = vld [vmem:[%s174_s9] sm:$0xff]  ;;  %s351_s18 = sshll.u32 %s591_s16, 3  ;;  %s202_s21 = scalar_lea.vmem [#allocation7], %s347_s7 }
  0x2e   : > { %v205_v1 = vsel %vm204_vm0, %v203_v0, 0.0  ;;  %v411_v24 = vld [vmem:[#allocation5] ss:$0 sm:$0xff]  ;;  %s255_s11 = scalar_lea.hbm %s721_s3, %s351_s18  ;;  %v412_v26 = vld [vmem:[%s720_s2] ss:$0 sm:$0xff]  ;;  %s257_s22 = sshll.u32 %s202_s21, 4  ;;  %s258_s22 = int_to_ptr.vmem [resolvable:$true] %s257_s22 }
  0x2f   : > { %206 = vadd.xlane.f32.xlu0 %v205_v1  ;;  %s259_s24 = sshll.u32 %s255_s11, 4  ;;  %s245_s16 = scalar_lea.sflag [#allocation4], %s663_s4  ;;  %s260_s24 = int_to_ptr.hbm [resolvable:$true] %s259_s24 }
  0x30   : > { %s491_s25 = sshra.s32 %s260_s24, 4  ;;  %s497_s6 = scalar_lea.hbm %s721_s3, 16  ;;  %s492_s25 = int_to_ptr.hbm [resolvable:$true] %s491_s25 }
  0x31   : > { %s493_s27 = scalar_lea.hbm %s492_s25, 8  ;;  %p498_p9 = scmp.lt.s32.totalorder %s492_s25, %s721_s3 }
  0x32   : > { %p494_p1 = scmp.ne.s32.totalorder %s492_s25, %s493_s27  ;;  %p499_p10 = scmp.lt.s32.totalorder %s497_s6, %s493_s27 }
  0x34   : > { %p495_p4 = pnand %p494_p1, %p636_p3  ;;  %p500_p2 = por %p499_p10, %p498_p9 }
  0x36   : > { %p496_p8 = pneg %p495_p4 }
  0x38   : > { %p501_p11 = pnand %p500_p2, %p496_p8 }
  0xa2   : > { %v207_v2 = vpop.xlane.xlu0 %206 }
  0xa3   : > { %v208_v3 = vmul.f32 0.03125, %v207_v2 }
  0xa5   : > { %v209_v4 = vsub.f32 %v203_v0, %v208_v3 }
  0xa7   : > { %v210_v5 = vmul.f32 %v209_v4, %v209_v4 }
  0xa9   : > { %v211_v6 = vsel %vm204_vm0, %v210_v5, 0.0 }
  0xaa   : > { %212 = vadd.xlane.f32.xlu0 %v211_v6 }
 0x11d   : > { %v213_v7 = vpop.xlane.xlu0 %212 }
 0x11e   : > { %v214_v8 = vmul.f32 0.032258064, %v213_v7 }
 0x120   : > { %413 = vrsqrt.f32 %v214_v8  ;;  %vm222_vm1 = vcmp.eq.f32.partialorder %v214_v8, inf  ;;  %v225_v16 = vand.u32 2147483648, %v214_v8  ;;  %vm224_vm2 = vcmp.eq.f32.partialorder %v214_v8, 0.0 }
 0x126   : > { %v414_v9 = vpop.eup %413 }
 0x127   : > { %v216_v10 = vmul.f32 %v414_v9, %v214_v8 }
 0x129   : > { %v217_v11 = vmul.f32 %v414_v9, %v216_v10 }
 0x12b   : > { %v218_v12 = vmul.f32 0.5, %v217_v11 }
 0x12d   : > { %v219_v13 = vsub.f32 1.5, %v218_v12 }
 0x12f   : > { %v220_v14 = vmul.f32 %v414_v9, %v219_v13 }
 0x131   : > { %v221_v15 = vmul.f32 %v220_v14, %v214_v8 }
 0x133   : > { %v223_v17 = vsel %vm222_vm1, %v214_v8, %v221_v15 }
 0x134   : > { %v226_v18 = vsel %vm224_vm2, %v225_v16, %v223_v17 }
 0x135   : > { %v227_v19 = vadd.f32 1e-06, %v226_v18 }
 0x137   : > { %415 = vrcp.f32 %v227_v19 }
 0x13d   : > { %v416_v20 = vpop.eup %415 }
 0x13e   : > { %v229_v21 = vmul.f32 %v416_v20, %v227_v19 }
 0x140   : > { %v230_v22 = vsub.f32 2.0, %v229_v21 }
 0x142   : > { %v231_v23 = vmul.f32 %v416_v20, %v230_v22 }
 0x144   : > { %v234_v25 = vmul.f32 %v231_v23, %v209_v4 }
 0x146   : > { %v238_v27 = vmul.f32 %v411_v24, %v234_v25 }
 0x148   : > { %v242_v28 = vadd.f32 %v412_v26, %v238_v27 }
 0x14a   : > { %243 = vst.msk [vmem:[%s202_s21] sm:$0xff] %vm204_vm0, %v242_v28 }
 0x14b   : > { %504 = shalt.err (!%p501_p11)
}
 0x14c   : > { %360 = dma.vmem_to_hbm [thread:$0]  (%p636_p3), %s258_s22, 128, %s260_s24, %s245_s16  }
 0x14d PF: > { %s271_s4 = sand.u32 1, %s535_s12   ;;  %p727_p12 = scmp.ge.s32.totalorder %s547_s15, 2 }
 0x14e   : > { %s272_s9 = scalar_lea.sflag [#allocation4], %s271_s4 }
 0x14f   : > { %p371_p13 = pnand %p727_p12, %p605_p6 }
 0x151   : > { %p372_p0 = pneg %p371_p13 }
 0x153   : > { %530 = dma.done.wait (%p372_p0), %s272_s9, 128  }
 0x154   : > { %532 = vsyncadd (%p372_p0), %s272_s9, 4294967168  ;;  %p17_p5 = scmp.ge.s32.totalorder %s623_s26, 4   ;;  %s728_s12 = smov %s539_s13 }
 0x155   : > { %s729_s13 = smov %s543_s14  ;;  %s730_s14 = smov %s632_s29 }
 0x156   : > { %s731_s15 = smov %s623_s26  ;;  %19 = sbr.rel (!%p17_p5) target bundleno = 6 (0x6), region = 81 }
 0x15b   :  { %278 = vsyncpa [#allocation3], 1 }
 0x15c   :  { %280 = vsyncpa [#allocation3 + $0x1], 1 }
 0x15d   :  { %281 = vsyncpa [#allocation6], 1 }
 0x15e   :  { %282 = vsyncpa [#allocation4], 1 }
 0x15f   :  { %284 = vsyncpa [#allocation4 + $0x1], 1 }

</bundles_post_ra>
